<compile_context>
chip_gen: v7x
topology: tpu7x:2x2x1
jax: 0.10.0
libtpu: 0.0.40
codegen_flags: <defaults>
</compile_context>

<pallas_src>
from functools import partial

import jax
import jax.numpy as jnp
from jax.experimental import pallas as pl
from jax.experimental.pallas import tpu as pltpu

NEG_SLOPE = 0.01  # F.leaky_relu default


def _leaky_relu(v):
    return jnp.where(v > 0, v, NEG_SLOPE * v)


def _round_up(n, m):
    return ((n + m - 1) // m) * m


# Block-diagonal (packed) weight slabs, all VMEM-resident across grid steps.
VMEM_ORDER = [
    "w1", "b1",
    "w1b", "b1b",
    "w2", "b2",
    "w3", "b3",
    "w4t", "w4x", "b4",
    "w5", "b5",
    "w5b", "b5b",
    "w5c",
]


def _random_effects_kernel(
    xy_ref, z_ref,
    w1_ref, b1_ref,
    w1b_ref, b1b_ref,
    w2_ref, b2_ref,
    w3_ref, b3_ref,
    w4t_ref, w4x_ref, b4_ref,
    w5_ref, b5_ref,
    w5b_ref, b5b_ref,
    w5c_ref,
    off_ref,                      # SMEM scalar: b5c*wout + bout
    out_ref,                      # packed slab: [newz | kld_elem | out]
):
    md = w1_ref.dtype             # MXU operand dtype (bf16 default / f32)
    GZ = z_ref.shape[1]           # PACK * z_size

    # Hoisted cast, reused for map1 and map4's x-contribution.
    xy = xy_ref[...].astype(md)   # (TB, PACK*(x_size+y_size))
    z = z_ref[...]                # (TB, PACK*z_size) f32

    def mm(a, w_ref):
        return jnp.dot(a.astype(md), w_ref[...],
                       preferred_element_type=jnp.float32)

    # ---- encoder ------------------------------------------------------
    # map1(cat(x, y)) as one block-diagonal dot (y is part of xy).
    t = _leaky_relu(
        jnp.dot(xy, w1_ref[...], preferred_element_type=jnp.float32)
        + b1_ref[...])
    t = _leaky_relu(mm(t, w1b_ref) + b1b_ref[...])

    # map2: single merged dot, split means/logvar with static lane slices.
    ml = mm(t, w2_ref) + b2_ref[...]           # (TB, 2*GZ)
    means = ml[:, :GZ]
    logvar = ml[:, GZ:]

    half_e = jnp.exp(0.5 * logvar)             # exp(logvar) == half_e * half_e
    kld_elem = -0.5 * (1.0 + logvar - means * means - half_e * half_e)
    newz = half_e * z + means

    # ---- decoder ------------------------------------------------------
    t = _leaky_relu(mm(newz, w3_ref) + b3_ref[...])
    # map4(cat(t, x)): two dots (t-part + x-part); the y-row of w4x is zero.
    # TODO(synk): a per-group lane concat would need 40 lanes/group (>128),
    # so the fused single-K map4 dot is skipped in the packed layout.
    t = jnp.maximum(
        mm(t, w4t_ref)
        + jnp.dot(xy, w4x_ref[...], preferred_element_type=jnp.float32)
        + b4_ref[...], 0.0)
    t = _leaky_relu(mm(t, w5_ref) + b5_ref[...])
    t = jnp.maximum(mm(t, w5b_ref) + b5b_ref[...], 0.0)

    # map5c with to_out = Linear(1,1) folded in (w5c*wout, offset in SMEM).
    out4 = mm(t, w5c_ref) + off_ref[0, 0]      # (TB, PACK)

    # Single packed output slab -> one output DMA stream per grid step.
    out_ref[:, 0:GZ] = newz
    out_ref[:, GZ:2 * GZ] = kld_elem
    out_ref[:, 2 * GZ:] = out4


def init_params(key, x_size, y_size, z_size, hidden_size):
    """Deterministic PyTorch-Linear-style init (uniform +/- 1/sqrt(fan_in)).
    Weights stored (in, out) so forward is `x @ W + b`."""

    def linear(k, fan_in, fan_out):
        kw, kb = jax.random.split(k)
        lim = 1.0 / jnp.sqrt(jnp.float32(fan_in))
        w = jax.random.uniform(kw, (fan_in, fan_out), jnp.float32, -lim, lim)
        b = jax.random.uniform(kb, (1, fan_out), jnp.float32, -lim, lim)
        return w, b

    keys = jax.random.split(key, 9)
    w1, b1 = linear(keys[0], x_size + y_size, hidden_size)
    w1b, b1b = linear(keys[1], hidden_size, hidden_size)
    w2, b2 = linear(keys[2], hidden_size, 2 * z_size)
    w3, b3 = linear(keys[3], z_size, hidden_size)
    w4, b4 = linear(keys[4], hidden_size + x_size, hidden_size)
    w5, b5 = linear(keys[5], hidden_size, hidden_size)
    w5b, b5b = linear(keys[6], hidden_size, hidden_size)
    w5c, b5c = linear(keys[7], hidden_size, y_size)
    wout, bout = linear(keys[8], 1, 1)
    return dict(w1=w1, b1=b1, w1b=w1b, b1b=b1b, w2=w2, b2=b2, w3=w3, b3=b3,
                w4=w4, b4=b4, w5=w5, b5=b5, w5b=w5b, b5b=b5b,
                w5c=w5c, b5c=b5c, wout=wout, bout=bout)


def _prepare_packed_params(p, y_size, z_size, pack, md):
    """Build block-diagonal weight slabs (4 rows per vreg for hidden=32),
    tile biases per group, merge map2, and fold the Linear(1,1) affine into
    map5c.  Matmul slabs are cast to the MXU operand dtype; biases stay f32."""
    H = p["w1b"].shape[0]
    eye = jnp.eye(pack, dtype=jnp.float32)
    bd = lambda w: jnp.kron(eye, w)            # block-diagonal expansion
    tb = lambda b: jnp.tile(b, (1, pack))      # per-group bias tiling

    w2m, w2l = p["w2"][:, :z_size], p["w2"][:, z_size:]
    b2m, b2l = p["b2"][:, :z_size], p["b2"][:, z_size:]
    w4t, w4x = p["w4"][:H], p["w4"][H:]
    # map4's x-contribution is driven by the packed (x, y) input; zero the y row.
    w4x_aug = jnp.concatenate([w4x, jnp.zeros((y_size, H), jnp.float32)], axis=0)
    w5c_eff = p["w5c"] * p["wout"][0, 0]       # fold to_out scale into map5c

    vmem = dict(
        w1=bd(p["w1"]).astype(md), b1=tb(p["b1"]),
        w1b=bd(p["w1b"]).astype(md), b1b=tb(p["b1b"]),
        w2=jnp.concatenate([bd(w2m), bd(w2l)], axis=1).astype(md),
        b2=jnp.concatenate([tb(b2m), tb(b2l)], axis=1),
        w3=bd(p["w3"]).astype(md), b3=tb(p["b3"]),
        w4t=bd(w4t).astype(md), w4x=bd(w4x_aug).astype(md), b4=tb(p["b4"]),
        w5=bd(p["w5"]).astype(md), b5=tb(p["b5"]),
        w5b=bd(p["w5b"]).astype(md), b5b=tb(p["b5b"]),
        w5c=bd(w5c_eff).astype(md),
    )
    offset = (p["b5c"][0, 0] * p["wout"][0, 0] + p["bout"][0, 0]).reshape(1, 1)
    return vmem, offset


@partial(jax.jit, static_argnames=("matmul_dtype", "batch_tile"))
def random_effects_forward(x, y, z, params,
                           matmul_dtype=jnp.bfloat16, batch_tile=2048):
    B, Xs = x.shape
    Ys = y.shape[1]
    Zs = z.shape[1]
    H = params["w1b"].shape[0]
    assert Ys == 1, "module requires y_size == 1 (to_out = nn.Linear(1, 1))"

    PACK = max(1, 128 // H)                   # rows packed per 128-lane vreg

    # Packed-row tiling: multiple of 8 sublanes; big default tile (2048 rows);
    # cap so the grid has >= 2 steps when possible (v7x dual-TC sharding).
    Bq = -(-B // PACK)                        # packed rows of real data
    tile_cap = max(8, _round_up(batch_tile // PACK, 8))
    TB = min(tile_cap, _round_up(Bq, 8))
    if Bq > 8:
        TB = min(TB, _round_up(-(-Bq // 2), 8))
    Bq_pad = _round_up(Bq, TB)
    Bp = Bq_pad * PACK                        # padded original-row count

    # Pack inputs: (B, F) -> (Bq_pad, PACK*F) via pad + row-major reshape.
    xy = jnp.concatenate([x, y], axis=1)      # (B, Xs+Ys)
    if Bp != B:
        xy = jnp.pad(xy, ((0, Bp - B), (0, 0)))
        z_in = jnp.pad(z, ((0, Bp - B), (0, 0)))
    else:
        z_in = z
    xy_p = xy.reshape(Bq_pad, PACK * (Xs + Ys))
    z_p = z_in.reshape(Bq_pad, PACK * Zs)

    vparams, offset = _prepare_packed_params(params, Ys, Zs, PACK, matmul_dtype)
    args = [xy_p, z_p] + [vparams[k] for k in VMEM_ORDER] + [offset]

    GZ = PACK * Zs
    slab_w = 2 * GZ + PACK                    # [newz | kld_elem | out]

    row = lambda feat: pl.BlockSpec((TB, feat), lambda i: (i, 0))
    resident = lambda a: pl.BlockSpec(a.shape, lambda i: (0, 0))
    smem = pl.BlockSpec(memory_space=pltpu.MemorySpace.SMEM)

    in_specs = ([row(PACK * (Xs + Ys)), row(GZ)]
                + [resident(vparams[k]) for k in VMEM_ORDER]
                + [smem])

    slab = pl.pallas_call(
        _random_effects_kernel,
        grid=(Bq_pad // TB,),
        out_shape=jax.ShapeDtypeStruct((Bq_pad, slab_w), jnp.float32),
        in_specs=in_specs,
        out_specs=row(slab_w),
        compiler_params=pltpu.CompilerParams(
            dimension_semantics=("parallel",),   # batch axis -> v7x 2-TC shard
            # VMEM is nowhere near a constraint on any generation (<2 MiB used);
            # this is just an explicit budget — do NOT shrink TB for v7x.
            vmem_limit_bytes=32 * 1024 * 1024,
        ),
    )(*args)

    newz = slab[:, :GZ].reshape(Bp, Zs)[:B]
    kld_elem = slab[:, GZ:2 * GZ].reshape(Bp, Zs)[:B]
    out = slab[:, 2 * GZ:].reshape(Bp, 1)[:B]
    kld = jnp.mean(jnp.sum(kld_elem, axis=1))
    return out, kld, newz


def reference_forward(x, y, z, p, matmul_dtype=jnp.float32, fold_out=False):
    """Pure-JAX reference mirroring the PyTorch forward (same matmul operand
    dtype as the kernel; fold_out=True mirrors the kernel's folded to_out)."""
    md = matmul_dtype
    mm = lambda a, w: jnp.dot(a.astype(md), w.astype(md),
                              preferred_element_type=jnp.float32)
    lrelu = lambda v: jnp.where(v > 0, v, NEG_SLOPE * v)
    Zs = z.shape[1]

    t = lrelu(mm(jnp.concatenate([x, y], axis=1), p["w1"]) + p["b1"])
    t = lrelu(mm(t, p["w1b"]) + p["b1b"])
    m2 = mm(t, p["w2"]) + p["b2"]
    means, logvar = m2[:, :Zs], m2[:, Zs:]
    kld = jnp.mean(-0.5 * jnp.sum(1.0 + logvar - means ** 2 - jnp.exp(logvar),
                                  axis=1))
    newz = jnp.exp(logvar / 2.0) * z + means
    t = lrelu(mm(newz, p["w3"]) + p["b3"])
    t = jnp.maximum(mm(jnp.concatenate([t, x], axis=1), p["w4"]) + p["b4"], 0.0)
    t = lrelu(mm(t, p["w5"]) + p["b5"])
    t = jnp.maximum(mm(t, p["w5b"]) + p["b5b"], 0.0)
    if fold_out:
        out = mm(t, p["w5c"] * p["wout"][0, 0]) \
              + (p["b5c"] * p["wout"][0, 0] + p["bout"])
    else:
        out = (mm(t, p["w5c"]) + p["b5c"]) * p["wout"][0, 0] + p["bout"]
    return out, kld, newz


if __name__ == "__main__":
    key = jax.random.PRNGKey(0)
    kx, ky, kz, kp = jax.random.split(key, 4)

    # small shapes consistent with the module (y_size must be 1 for Linear(1,1))
    B, X_SIZE, Y_SIZE, Z_SIZE, HIDDEN = 8, 8, 1, 8, 32

    x = jax.random.normal(kx, (B, X_SIZE), jnp.float32)
    y = jax.random.normal(ky, (B, Y_SIZE), jnp.float32)
    z = jax.random.normal(kz, (B, Z_SIZE), jnp.float32)
    params = init_params(kp, X_SIZE, Y_SIZE, Z_SIZE, HIDDEN)

    # 1) f32 matmul mode vs PyTorch-order reference.
    out32, kld32, newz32 = random_effects_forward(x, y, z, params,
                                                  matmul_dtype=jnp.float32)
    jax.block_until_ready((out32, kld32, newz32))
    r_out, r_kld, r_newz = reference_forward(x, y, z, params,
                                             matmul_dtype=jnp.float32,
                                             fold_out=False)
    assert jnp.allclose(out32, r_out, atol=1e-4, rtol=1e-4), "f32 out mismatch"
    assert jnp.allclose(kld32, r_kld, atol=1e-4, rtol=1e-4), "f32 kld mismatch"
    assert jnp.allclose(newz32, r_newz, atol=1e-4, rtol=1e-4), "f32 newz mismatch"

    # 2) default bf16 MXU-operand mode (perf path on v6e/v7x), vs a matching
    #    bf16 reference with the same folded to_out.
    out_b, kld_b, newz_b = random_effects_forward(x, y, z, params)
    jax.block_until_ready((out_b, kld_b, newz_b))
    rb_out, rb_kld, rb_newz = reference_forward(x, y, z, params,
                                                matmul_dtype=jnp.bfloat16,
                                                fold_out=True)
    assert jnp.allclose(out_b, rb_out, atol=2e-3, rtol=2e-3), "bf16 out mismatch"
    assert jnp.allclose(kld_b, rb_kld, atol=2e-3, rtol=2e-3), "bf16 kld mismatch"
    assert jnp.allclose(newz_b, rb_newz, atol=2e-3, rtol=2e-3), "bf16 newz mismatch"

    # 3) larger, non-multiple-of-PACK batch: exercises padding and a >=2-step
    #    grid (v7x dual-TC path).
    B2 = 200
    k2x, k2y, k2z = jax.random.split(jax.random.PRNGKey(1), 3)
    x2 = jax.random.normal(k2x, (B2, X_SIZE), jnp.float32)
    y2 = jax.random.normal(k2y, (B2, Y_SIZE), jnp.float32)
    z2 = jax.random.normal(k2z, (B2, Z_SIZE), jnp.float32)
    out2, kld2, newz2 = random_effects_forward(x2, y2, z2, params,
                                               matmul_dtype=jnp.float32)
    jax.block_until_ready((out2, kld2, newz2))
    r2_out, r2_kld, r2_newz = reference_forward(x2, y2, z2, params,
                                                matmul_dtype=jnp.float32,
                                                fold_out=False)
    assert jnp.allclose(out2, r2_out, atol=1e-4, rtol=1e-4), "big-B out mismatch"
    assert jnp.allclose(kld2, r2_kld, atol=1e-4, rtol=1e-4), "big-B kld mismatch"
    assert jnp.allclose(newz2, r2_newz, atol=1e-4, rtol=1e-4), "big-B newz mismatch"

    print("KERNEL_OK")
</pallas_src>

<mosaic_0001>
module attributes {stable_mosaic.version = 11 : i64} {
  func.func @_random_effects_kernel(%arg0: i32, %arg1: memref<8x36xf32, #tpu.memory_space<vmem>>, %arg2: memref<8x32xf32, #tpu.memory_space<vmem>>, %arg3: memref<36x128xf32, #tpu.memory_space<vmem>>, %arg4: memref<1x128xf32, #tpu.memory_space<vmem>>, %arg5: memref<128x128xf32, #tpu.memory_space<vmem>>, %arg6: memref<1x128xf32, #tpu.memory_space<vmem>>, %arg7: memref<128x64xf32, #tpu.memory_space<vmem>>, %arg8: memref<1x64xf32, #tpu.memory_space<vmem>>, %arg9: memref<32x128xf32, #tpu.memory_space<vmem>>, %arg10: memref<1x128xf32, #tpu.memory_space<vmem>>, %arg11: memref<128x128xf32, #tpu.memory_space<vmem>>, %arg12: memref<36x128xf32, #tpu.memory_space<vmem>>, %arg13: memref<1x128xf32, #tpu.memory_space<vmem>>, %arg14: memref<128x128xf32, #tpu.memory_space<vmem>>, %arg15: memref<1x128xf32, #tpu.memory_space<vmem>>, %arg16: memref<128x128xf32, #tpu.memory_space<vmem>>, %arg17: memref<1x128xf32, #tpu.memory_space<vmem>>, %arg18: memref<128x4xf32, #tpu.memory_space<vmem>>, %arg19: memref<1x1xf32, #tpu.memory_space<smem>>, %arg20: memref<8x68xf32, #tpu.memory_space<vmem>>) attributes {dimension_semantics = [#tpu.dimension_semantics<parallel>], iteration_bounds = array<i64: 1>, scalar_prefetch = 0 : i64, scratch_operands = 0 : i64, tpu.core_type = #tpu.core_type<tc>, window_params = [{transform_indices = @transform_0, window_bounds = array<i64: 8, 36>}, {transform_indices = @transform_1, window_bounds = array<i64: 8, 32>}, {pipeline_mode = #tpu.pipeline_mode<synchronous>, transform_indices = @transform_2, window_bounds = array<i64: 36, 128>}, {pipeline_mode = #tpu.pipeline_mode<synchronous>, transform_indices = @transform_3, window_bounds = array<i64: 1, 128>}, {pipeline_mode = #tpu.pipeline_mode<synchronous>, transform_indices = @transform_4, window_bounds = array<i64: 128, 128>}, {pipeline_mode = #tpu.pipeline_mode<synchronous>, transform_indices = @transform_5, window_bounds = array<i64: 1, 128>}, {pipeline_mode = #tpu.pipeline_mode<synchronous>, transform_indices = @transform_6, window_bounds = array<i64: 128, 64>}, {pipeline_mode = #tpu.pipeline_mode<synchronous>, transform_indices = @transform_7, window_bounds = array<i64: 1, 64>}, {pipeline_mode = #tpu.pipeline_mode<synchronous>, transform_indices = @transform_8, window_bounds = array<i64: 32, 128>}, {pipeline_mode = #tpu.pipeline_mode<synchronous>, transform_indices = @transform_9, window_bounds = array<i64: 1, 128>}, {pipeline_mode = #tpu.pipeline_mode<synchronous>, transform_indices = @transform_10, window_bounds = array<i64: 128, 128>}, {pipeline_mode = #tpu.pipeline_mode<synchronous>, transform_indices = @transform_11, window_bounds = array<i64: 36, 128>}, {pipeline_mode = #tpu.pipeline_mode<synchronous>, transform_indices = @transform_12, window_bounds = array<i64: 1, 128>}, {pipeline_mode = #tpu.pipeline_mode<synchronous>, transform_indices = @transform_13, window_bounds = array<i64: 128, 128>}, {pipeline_mode = #tpu.pipeline_mode<synchronous>, transform_indices = @transform_14, window_bounds = array<i64: 1, 128>}, {pipeline_mode = #tpu.pipeline_mode<synchronous>, transform_indices = @transform_15, window_bounds = array<i64: 128, 128>}, {pipeline_mode = #tpu.pipeline_mode<synchronous>, transform_indices = @transform_16, window_bounds = array<i64: 1, 128>}, {pipeline_mode = #tpu.pipeline_mode<synchronous>, transform_indices = @transform_17, window_bounds = array<i64: 128, 4>}, {transform_indices = @transform_18, window_bounds = array<i64: 1, 1>}, {transform_indices = @transform_19, window_bounds = array<i64: 8, 68>}]} {
    %c0 = arith.constant 0 : index
    %c0_0 = arith.constant 0 : index
    %0 = vector.load %arg1[%c0, %c0_0] : memref<8x36xf32, #tpu.memory_space<vmem>>, vector<8x36xf32>
    %c0_1 = arith.constant 0 : index
    %c0_2 = arith.constant 0 : index
    %1 = vector.load %arg2[%c0_1, %c0_2] : memref<8x32xf32, #tpu.memory_space<vmem>>, vector<8x32xf32>
    %c0_3 = arith.constant 0 : index
    %c0_4 = arith.constant 0 : index
    %2 = vector.load %arg3[%c0_3, %c0_4] : memref<36x128xf32, #tpu.memory_space<vmem>>, vector<36x128xf32>
    %cst = arith.constant dense<0.000000e+00> : vector<8x128xf32>
    %3 = tpu.matmul %0, %2, %cst {dimension_numbers = #tpu.dot_dimension_numbers<[1], [0], [0], [1], [0, 0, 1, 1], [], []>} : vector<8x36xf32>, vector<36x128xf32>, vector<8x128xf32> -> vector<8x128xf32>
    %c0_5 = arith.constant 0 : index
    %c0_6 = arith.constant 0 : index
    %4 = vector.load %arg4[%c0_5, %c0_6] : memref<1x128xf32, #tpu.memory_space<vmem>>, vector<1x128xf32>
    %5 = vector.broadcast %4 : vector<1x128xf32> to vector<8x128xf32>
    %6 = arith.addf %3, %5 : vector<8x128xf32>
    %cst_7 = arith.constant 0.000000e+00 : f32
    %7 = vector.broadcast %cst_7 : f32 to vector<8x128xf32>
    %8 = arith.cmpf ogt, %6, %7 : vector<8x128xf32>
    %cst_8 = arith.constant 0.00999999977 : f32
    %9 = vector.broadcast %cst_8 : f32 to vector<8x128xf32>
    %10 = arith.mulf %9, %6 : vector<8x128xf32>
    %11 = arith.select %8, %6, %10 : vector<8x128xi1>, vector<8x128xf32>
    %c0_9 = arith.constant 0 : index
    %c0_10 = arith.constant 0 : index
    %12 = vector.load %arg5[%c0_9, %c0_10] : memref<128x128xf32, #tpu.memory_space<vmem>>, vector<128x128xf32>
    %cst_11 = arith.constant dense<0.000000e+00> : vector<8x128xf32>
    %13 = tpu.matmul %11, %12, %cst_11 {dimension_numbers = #tpu.dot_dimension_numbers<[1], [0], [0], [1], [0, 0, 1, 1], [], []>} : vector<8x128xf32>, vector<128x128xf32>, vector<8x128xf32> -> vector<8x128xf32>
    %c0_12 = arith.constant 0 : index
    %c0_13 = arith.constant 0 : index
    %14 = vector.load %arg6[%c0_12, %c0_13] : memref<1x128xf32, #tpu.memory_space<vmem>>, vector<1x128xf32>
    %15 = vector.broadcast %14 : vector<1x128xf32> to vector<8x128xf32>
    %16 = arith.addf %13, %15 : vector<8x128xf32>
    %cst_14 = arith.constant 0.000000e+00 : f32
    %17 = vector.broadcast %cst_14 : f32 to vector<8x128xf32>
    %18 = arith.cmpf ogt, %16, %17 : vector<8x128xf32>
    %cst_15 = arith.constant 0.00999999977 : f32
    %19 = vector.broadcast %cst_15 : f32 to vector<8x128xf32>
    %20 = arith.mulf %19, %16 : vector<8x128xf32>
    %21 = arith.select %18, %16, %20 : vector<8x128xi1>, vector<8x128xf32>
    %c0_16 = arith.constant 0 : index
    %c0_17 = arith.constant 0 : index
    %22 = vector.load %arg7[%c0_16, %c0_17] : memref<128x64xf32, #tpu.memory_space<vmem>>, vector<128x64xf32>
    %cst_18 = arith.constant dense<0.000000e+00> : vector<8x64xf32>
    %23 = tpu.matmul %21, %22, %cst_18 {dimension_numbers = #tpu.dot_dimension_numbers<[1], [0], [0], [1], [0, 0, 1, 1], [], []>} : vector<8x128xf32>, vector<128x64xf32>, vector<8x64xf32> -> vector<8x64xf32>
    %c0_19 = arith.constant 0 : index
    %c0_20 = arith.constant 0 : index
    %24 = vector.load %arg8[%c0_19, %c0_20] : memref<1x64xf32, #tpu.memory_space<vmem>>, vector<1x64xf32>
    %25 = vector.broadcast %24 : vector<1x64xf32> to vector<8x64xf32>
    %26 = arith.addf %23, %25 : vector<8x64xf32>
    %27 = vector.extract_strided_slice %26 {offsets = [0, 0], sizes = [8, 32], strides = [1, 1]} : vector<8x64xf32> to vector<8x32xf32>
    %28 = vector.extract_strided_slice %26 {offsets = [0, 32], sizes = [8, 32], strides = [1, 1]} : vector<8x64xf32> to vector<8x32xf32>
    %cst_21 = arith.constant 5.000000e-01 : f32
    %29 = vector.broadcast %cst_21 : f32 to vector<8x32xf32>
    %30 = arith.mulf %29, %28 : vector<8x32xf32>
    %31 = math.exp %30 : vector<8x32xf32>
    %cst_22 = arith.constant 1.000000e+00 : f32
    %32 = vector.broadcast %cst_22 : f32 to vector<8x32xf32>
    %33 = arith.addf %32, %28 : vector<8x32xf32>
    %34 = arith.mulf %27, %27 : vector<8x32xf32>
    %35 = arith.subf %33, %34 : vector<8x32xf32>
    %36 = arith.mulf %31, %31 : vector<8x32xf32>
    %37 = arith.subf %35, %36 : vector<8x32xf32>
    %cst_23 = arith.constant -5.000000e-01 : f32
    %38 = vector.broadcast %cst_23 : f32 to vector<8x32xf32>
    %39 = arith.mulf %38, %37 : vector<8x32xf32>
    %40 = arith.mulf %31, %1 : vector<8x32xf32>
    %41 = arith.addf %40, %27 : vector<8x32xf32>
    %c0_24 = arith.constant 0 : index
    %c0_25 = arith.constant 0 : index
    %42 = vector.load %arg9[%c0_24, %c0_25] : memref<32x128xf32, #tpu.memory_space<vmem>>, vector<32x128xf32>
    %cst_26 = arith.constant dense<0.000000e+00> : vector<8x128xf32>
    %43 = tpu.matmul %41, %42, %cst_26 {dimension_numbers = #tpu.dot_dimension_numbers<[1], [0], [0], [1], [0, 0, 1, 1], [], []>} : vector<8x32xf32>, vector<32x128xf32>, vector<8x128xf32> -> vector<8x128xf32>
    %c0_27 = arith.constant 0 : index
    %c0_28 = arith.constant 0 : index
    %44 = vector.load %arg10[%c0_27, %c0_28] : memref<1x128xf32, #tpu.memory_space<vmem>>, vector<1x128xf32>
    %45 = vector.broadcast %44 : vector<1x128xf32> to vector<8x128xf32>
    %46 = arith.addf %43, %45 : vector<8x128xf32>
    %cst_29 = arith.constant 0.000000e+00 : f32
    %47 = vector.broadcast %cst_29 : f32 to vector<8x128xf32>
    %48 = arith.cmpf ogt, %46, %47 : vector<8x128xf32>
    %cst_30 = arith.constant 0.00999999977 : f32
    %49 = vector.broadcast %cst_30 : f32 to vector<8x128xf32>
    %50 = arith.mulf %49, %46 : vector<8x128xf32>
    %51 = arith.select %48, %46, %50 : vector<8x128xi1>, vector<8x128xf32>
    %c0_31 = arith.constant 0 : index
    %c0_32 = arith.constant 0 : index
    %52 = vector.load %arg11[%c0_31, %c0_32] : memref<128x128xf32, #tpu.memory_space<vmem>>, vector<128x128xf32>
    %cst_33 = arith.constant dense<0.000000e+00> : vector<8x128xf32>
    %53 = tpu.matmul %51, %52, %cst_33 {dimension_numbers = #tpu.dot_dimension_numbers<[1], [0], [0], [1], [0, 0, 1, 1], [], []>} : vector<8x128xf32>, vector<128x128xf32>, vector<8x128xf32> -> vector<8x128xf32>
    %c0_34 = arith.constant 0 : index
    %c0_35 = arith.constant 0 : index
    %54 = vector.load %arg12[%c0_34, %c0_35] : memref<36x128xf32, #tpu.memory_space<vmem>>, vector<36x128xf32>
    %cst_36 = arith.constant dense<0.000000e+00> : vector<8x128xf32>
    %55 = tpu.matmul %0, %54, %cst_36 {dimension_numbers = #tpu.dot_dimension_numbers<[1], [0], [0], [1], [0, 0, 1, 1], [], []>} : vector<8x36xf32>, vector<36x128xf32>, vector<8x128xf32> -> vector<8x128xf32>
    %56 = arith.addf %53, %55 : vector<8x128xf32>
    %c0_37 = arith.constant 0 : index
    %c0_38 = arith.constant 0 : index
    %57 = vector.load %arg13[%c0_37, %c0_38] : memref<1x128xf32, #tpu.memory_space<vmem>>, vector<1x128xf32>
    %58 = vector.broadcast %57 : vector<1x128xf32> to vector<8x128xf32>
    %59 = arith.addf %56, %58 : vector<8x128xf32>
    %cst_39 = arith.constant 0.000000e+00 : f32
    %60 = vector.broadcast %cst_39 : f32 to vector<8x128xf32>
    %61 = arith.maximumf %59, %60 : vector<8x128xf32>
    %c0_40 = arith.constant 0 : index
    %c0_41 = arith.constant 0 : index
    %62 = vector.load %arg14[%c0_40, %c0_41] : memref<128x128xf32, #tpu.memory_space<vmem>>, vector<128x128xf32>
    %cst_42 = arith.constant dense<0.000000e+00> : vector<8x128xf32>
    %63 = tpu.matmul %61, %62, %cst_42 {dimension_numbers = #tpu.dot_dimension_numbers<[1], [0], [0], [1], [0, 0, 1, 1], [], []>} : vector<8x128xf32>, vector<128x128xf32>, vector<8x128xf32> -> vector<8x128xf32>
    %c0_43 = arith.constant 0 : index
    %c0_44 = arith.constant 0 : index
    %64 = vector.load %arg15[%c0_43, %c0_44] : memref<1x128xf32, #tpu.memory_space<vmem>>, vector<1x128xf32>
    %65 = vector.broadcast %64 : vector<1x128xf32> to vector<8x128xf32>
    %66 = arith.addf %63, %65 : vector<8x128xf32>
    %cst_45 = arith.constant 0.000000e+00 : f32
    %67 = vector.broadcast %cst_45 : f32 to vector<8x128xf32>
    %68 = arith.cmpf ogt, %66, %67 : vector<8x128xf32>
    %cst_46 = arith.constant 0.00999999977 : f32
    %69 = vector.broadcast %cst_46 : f32 to vector<8x128xf32>
    %70 = arith.mulf %69, %66 : vector<8x128xf32>
    %71 = arith.select %68, %66, %70 : vector<8x128xi1>, vector<8x128xf32>
    %c0_47 = arith.constant 0 : index
    %c0_48 = arith.constant 0 : index
    %72 = vector.load %arg16[%c0_47, %c0_48] : memref<128x128xf32, #tpu.memory_space<vmem>>, vector<128x128xf32>
    %cst_49 = arith.constant dense<0.000000e+00> : vector<8x128xf32>
    %73 = tpu.matmul %71, %72, %cst_49 {dimension_numbers = #tpu.dot_dimension_numbers<[1], [0], [0], [1], [0, 0, 1, 1], [], []>} : vector<8x128xf32>, vector<128x128xf32>, vector<8x128xf32> -> vector<8x128xf32>
    %c0_50 = arith.constant 0 : index
    %c0_51 = arith.constant 0 : index
    %74 = vector.load %arg17[%c0_50, %c0_51] : memref<1x128xf32, #tpu.memory_space<vmem>>, vector<1x128xf32>
    %75 = vector.broadcast %74 : vector<1x128xf32> to vector<8x128xf32>
    %76 = arith.addf %73, %75 : vector<8x128xf32>
    %cst_52 = arith.constant 0.000000e+00 : f32
    %77 = vector.broadcast %cst_52 : f32 to vector<8x128xf32>
    %78 = arith.maximumf %76, %77 : vector<8x128xf32>
    %c0_53 = arith.constant 0 : index
    %c0_54 = arith.constant 0 : index
    %79 = vector.load %arg18[%c0_53, %c0_54] : memref<128x4xf32, #tpu.memory_space<vmem>>, vector<128x4xf32>
    %cst_55 = arith.constant dense<0.000000e+00> : vector<8x4xf32>
    %80 = tpu.matmul %78, %79, %cst_55 {dimension_numbers = #tpu.dot_dimension_numbers<[1], [0], [0], [1], [0, 0, 1, 1], [], []>} : vector<8x128xf32>, vector<128x4xf32>, vector<8x4xf32> -> vector<8x4xf32>
    %c0_56 = arith.constant 0 : index
    %c0_57 = arith.constant 0 : index
    %81 = memref.load %arg19[%c0_56, %c0_57] : memref<1x1xf32, #tpu.memory_space<smem>>
    %82 = vector.broadcast %81 : f32 to vector<8x4xf32>
    %83 = arith.addf %80, %82 : vector<8x4xf32>
    %c0_58 = arith.constant 0 : index
    %c0_59 = arith.constant 0 : index
    %84 = vector.load %arg20[%c0_58, %c0_59] : memref<8x68xf32, #tpu.memory_space<vmem>>, vector<8x32xf32>
    tpu.vector_store %arg20[%c0_58, %c0_59], %41 {strides = array<i32>} : memref<8x68xf32, #tpu.memory_space<vmem>>, vector<8x32xf32>,
    %c0_60 = arith.constant 0 : index
    %c32 = arith.constant 32 : index
    %85 = vector.load %arg20[%c0_60, %c32] : memref<8x68xf32, #tpu.memory_space<vmem>>, vector<8x32xf32>
    tpu.vector_store %arg20[%c0_60, %c32], %39 {strides = array<i32>} : memref<8x68xf32, #tpu.memory_space<vmem>>, vector<8x32xf32>,
    %c0_61 = arith.constant 0 : index
    %c64 = arith.constant 64 : index
    %86 = vector.load %arg20[%c0_61, %c64] : memref<8x68xf32, #tpu.memory_space<vmem>>, vector<8x4xf32>
    tpu.vector_store %arg20[%c0_61, %c64], %83 {strides = array<i32>} : memref<8x68xf32, #tpu.memory_space<vmem>>, vector<8x4xf32>,
    return
  }
  func.func @transform_0(%arg0: i32) -> (i32, i32) {
    %c0_i32 = arith.constant 0 : i32
    %c0_i32_0 = arith.constant 0 : i32
    return %arg0, %c0_i32 : i32, i32
  }
  func.func @transform_1(%arg0: i32) -> (i32, i32) {
    %c0_i32 = arith.constant 0 : i32
    %c0_i32_0 = arith.constant 0 : i32
    return %arg0, %c0_i32 : i32, i32
  }
  func.func @transform_2(%arg0: i32) -> (i32, i32) {
    %c0_i32 = arith.constant 0 : i32
    %c0_i32_0 = arith.constant 0 : i32
    %c0_i32_1 = arith.constant 0 : i32
    return %c0_i32, %c0_i32_0 : i32, i32
  }
  func.func @transform_3(%arg0: i32) -> (i32, i32) {
    %c0_i32 = arith.constant 0 : i32
    %c0_i32_0 = arith.constant 0 : i32
    %c0_i32_1 = arith.constant 0 : i32
    return %c0_i32, %c0_i32_0 : i32, i32
  }
  func.func @transform_4(%arg0: i32) -> (i32, i32) {
    %c0_i32 = arith.constant 0 : i32
    %c0_i32_0 = arith.constant 0 : i32
    %c0_i32_1 = arith.constant 0 : i32
    return %c0_i32, %c0_i32_0 : i32, i32
  }
  func.func @transform_5(%arg0: i32) -> (i32, i32) {
    %c0_i32 = arith.constant 0 : i32
    %c0_i32_0 = arith.constant 0 : i32
    %c0_i32_1 = arith.constant 0 : i32
    return %c0_i32, %c0_i32_0 : i32, i32
  }
  func.func @transform_6(%arg0: i32) -> (i32, i32) {
    %c0_i32 = arith.constant 0 : i32
    %c0_i32_0 = arith.constant 0 : i32
    %c0_i32_1 = arith.constant 0 : i32
    return %c0_i32, %c0_i32_0 : i32, i32
  }
  func.func @transform_7(%arg0: i32) -> (i32, i32) {
    %c0_i32 = arith.constant 0 : i32
    %c0_i32_0 = arith.constant 0 : i32
    %c0_i32_1 = arith.constant 0 : i32
    return %c0_i32, %c0_i32_0 : i32, i32
  }
  func.func @transform_8(%arg0: i32) -> (i32, i32) {
    %c0_i32 = arith.constant 0 : i32
    %c0_i32_0 = arith.constant 0 : i32
    %c0_i32_1 = arith.constant 0 : i32
    return %c0_i32, %c0_i32_0 : i32, i32
  }
  func.func @transform_9(%arg0: i32) -> (i32, i32) {
    %c0_i32 = arith.constant 0 : i32
    %c0_i32_0 = arith.constant 0 : i32
    %c0_i32_1 = arith.constant 0 : i32
    return %c0_i32, %c0_i32_0 : i32, i32
  }
  func.func @transform_10(%arg0: i32) -> (i32, i32) {
    %c0_i32 = arith.constant 0 : i32
    %c0_i32_0 = arith.constant 0 : i32
    %c0_i32_1 = arith.constant 0 : i32
    return %c0_i32, %c0_i32_0 : i32, i32
  }
  func.func @transform_11(%arg0: i32) -> (i32, i32) {
    %c0_i32 = arith.constant 0 : i32
    %c0_i32_0 = arith.constant 0 : i32
    %c0_i32_1 = arith.constant 0 : i32
    return %c0_i32, %c0_i32_0 : i32, i32
  }
  func.func @transform_12(%arg0: i32) -> (i32, i32) {
    %c0_i32 = arith.constant 0 : i32
    %c0_i32_0 = arith.constant 0 : i32
    %c0_i32_1 = arith.constant 0 : i32
    return %c0_i32, %c0_i32_0 : i32, i32
  }
  func.func @transform_13(%arg0: i32) -> (i32, i32) {
    %c0_i32 = arith.constant 0 : i32
    %c0_i32_0 = arith.constant 0 : i32
    %c0_i32_1 = arith.constant 0 : i32
    return %c0_i32, %c0_i32_0 : i32, i32
  }
  func.func @transform_14(%arg0: i32) -> (i32, i32) {
    %c0_i32 = arith.constant 0 : i32
    %c0_i32_0 = arith.constant 0 : i32
    %c0_i32_1 = arith.constant 0 : i32
    return %c0_i32, %c0_i32_0 : i32, i32
  }
  func.func @transform_15(%arg0: i32) -> (i32, i32) {
    %c0_i32 = arith.constant 0 : i32
    %c0_i32_0 = arith.constant 0 : i32
    %c0_i32_1 = arith.constant 0 : i32
    return %c0_i32, %c0_i32_0 : i32, i32
  }
  func.func @transform_16(%arg0: i32) -> (i32, i32) {
    %c0_i32 = arith.constant 0 : i32
    %c0_i32_0 = arith.constant 0 : i32
    %c0_i32_1 = arith.constant 0 : i32
    return %c0_i32, %c0_i32_0 : i32, i32
  }
  func.func @transform_17(%arg0: i32) -> (i32, i32) {
    %c0_i32 = arith.constant 0 : i32
    %c0_i32_0 = arith.constant 0 : i32
    %c0_i32_1 = arith.constant 0 : i32
    return %c0_i32, %c0_i32_0 : i32, i32
  }
  func.func @transform_18(%arg0: i32) -> (i32, i32) {
    %c0_i32 = arith.constant 0 : i32
    %c0_i32_0 = arith.constant 0 : i32
    %c0_i32_1 = arith.constant 0 : i32
    return %c0_i32, %c0_i32_0 : i32, i32
  }
  func.func @transform_19(%arg0: i32) -> (i32, i32) {
    %c0_i32 = arith.constant 0 : i32
    %c0_i32_0 = arith.constant 0 : i32
    return %arg0, %c0_i32 : i32, i32
  }
}

</mosaic_0001>

<bundles_post_ra>
// kernel: random_effects_forward.1
= control target key start
LH: loop header
LB: loop body
LE: loop exit
PB: predicated region body
PF: predicated region fallthrough
CT: control target
= control target key end

     0   :  { %v1473_v0 = vmov 0.0|0.0   ;;  %vm1474_vm0 = vmmov 0   ;;  %v1475_v4 = vmov 0.0   ;;  %vm81_vm1 = vcmask 1043456   ;;  %s1476_s29 = smov 32   ;;  %s1478_s21 = smov 64   ;;  %s2040_s2 = inlined_call_operand.vmem [shape: f32[36,128], index: 2, kind: input, shape index: {}]   ;;  %s2041_s4 = inlined_call_operand.vmem [shape: f32[128,128], index: 4, kind: input, shape index: {}]   ;;  %s2042_s0 = inlined_call_operand.vmem [shape: f32[8,36], index: 0, kind: input, shape index: {}]   ;;  %s2043_s6 = inlined_call_operand.vmem [shape: f32[128,64], index: 6, kind: input, shape index: {}]   ;;  %s2044_s3 = inlined_call_operand.vmem [shape: f32[1,128], index: 3, kind: input, shape index: {}]   ;;  %s2045_s1 = inlined_call_operand.vmem [shape: f32[8,32], index: 1, kind: input, shape index: {}]   ;;  %s2046_s5 = inlined_call_operand.vmem [shape: f32[1,128], index: 5, kind: input, shape index: {}]   ;;  %s2047_s7 = inlined_call_operand.vmem [shape: f32[1,64], index: 7, kind: input, shape index: {}]   ;;  %s2048_s8 = inlined_call_operand.vmem [shape: f32[32,128], index: 8, kind: input, shape index: {}]   ;;  %s2049_s10 = inlined_call_operand.vmem [shape: f32[128,128], index: 10, kind: input, shape index: {}]   ;;  %s2050_s11 = inlined_call_operand.vmem [shape: f32[36,128], index: 11, kind: input, shape index: {}]   ;;  %s2051_s19 = inlined_call_operand.vmem [shape: f32[8,68], index: 19, kind: output, shape index: {}]   ;;  %s2052_s13 = inlined_call_operand.vmem [shape: f32[128,128], index: 13, kind: input, shape index: {}]   ;;  %s2053_s9 = inlined_call_operand.vmem [shape: f32[1,128], index: 9, kind: input, shape index: {}]   ;;  %s2054_s15 = inlined_call_operand.vmem [shape: f32[128,128], index: 15, kind: input, shape index: {}]   ;;  %s2055_s12 = inlined_call_operand.vmem [shape: f32[1,128], index: 12, kind: input, shape index: {}]   ;;  %s2056_s17 = inlined_call_operand.vmem [shape: f32[128,4], index: 17, kind: input, shape index: {}]   ;;  %s2057_s14 = inlined_call_operand.vmem [shape: f32[1,128], index: 14, kind: input, shape index: {}]   ;;  %s2058_s16 = inlined_call_operand.vmem [shape: f32[1,128], index: 16, kind: input, shape index: {}]   ;;  %s2059_s18 = inlined_call_operand.<no memory space> [shape: f32[1,1], index: 18, kind: input, shape index: {}]  }
   0x1   :  { %2063 = sst [smem:[#allocation3_spill]] %s2040_s2  ;;  %1303 = vmatprep.subr.bf16.mxu0 %v1473_v0  ;;  %1066 = vmatprep.mubr.msk.f32.mxu0 %vm1474_vm0, %v1475_v4  ;;  %vm77_vm2 = vcmask 293888   ;;  %v925_v55 = vld [vmem:[%s2044_s3] ss:$0 sm:$0xff]  ;;  %s1477_s2 = smov 96   ;;  %vm384_vm5 = vcmask 261120  }
   0x2   :  { %2064 = sst [smem:[#allocation4_spill]] %s2041_s4  ;;  %s2067_s20 = sld [smem:[#allocation3_spill]]  ;;  %1309 = vmatprep.subr.bf16.mxu1 %v1473_v0  ;;  %1101 = vmatprep.mubr.msk.f32.mxu1 %vm1474_vm0, %v1475_v4  ;;  %vm913_vm6 = vcmask 523520   ;;  %vm919_vm9 = vcmask 556544  }
   0x3   :  { %2065 = sst [smem:[#allocation5_spill]] %s2042_s0  ;;  %s2068_s26 = sld [smem:[#allocation4_spill]] }
   0x4   :  { %2066 = sst [smem:[#allocation6_spill]] %s2043_s6  ;;  %s2069_s28 = sld [smem:[#allocation5_spill]] }
   0x5   :  { %s2070_s23 = sld [smem:[#allocation6_spill]] }
   0x8   :  { %v65_v1 = vld [vmem:[%s2067_s20] sm:$0xff]  ;;  %v66_v2 = vld [vmem:[%s2067_s20 + $0x8] sm:$0xff]  ;;  %v67_v3 = vld [vmem:[%s2067_s20 + $0x10] sm:$0xff] }
   0x9   :  { %v1304_v5 = vpack.c.bf16 %v66_v2, %v65_v1  ;;  %v68_v6 = vld [vmem:[%s2067_s20 + $0x18] sm:$0xff]  ;;  %v158_v7 = vld [vmem:[%s2068_s26] sm:$0xff]  ;;  %v159_v8 = vld [vmem:[%s2068_s26 + $0x8] sm:$0xff] }
   0xa   :  { %v160_v9 = vld [vmem:[%s2068_s26 + $0x10] sm:$0xff]  ;;  %v1307_v10 = vpack.c.bf16 %v68_v6, %v67_v3  ;;  %v1310_v11 = vpack.c.bf16 %v159_v8, %v158_v7  ;;  %v161_v12 = vld [vmem:[%s2068_s26 + $0x18] sm:$0xff]  ;;  %v162_v14 = vld [vmem:[%s2068_s26 + $0x20] sm:$0xff] }
   0xb   :  { %1305 = vmatpush3.bf16.msra.mxu0 %v1304_v5  ;;  %v1313_v13 = vpack.c.bf16 %v161_v12, %v160_v9  ;;  %v163_v15 = vld [vmem:[%s2068_s26 + $0x28] sm:$0xff]  ;;  %v69_v16 = vld [vmem:[%s2067_s20 + $0x20] sm:$0xf]  ;;  %v164_v19 = vld [vmem:[%s2068_s26 + $0x30] sm:$0xff] }
   0xc   :  { %1306 = vmatprep.subr.bf16.mxu0 %v1473_v0  ;;  %1311 = vmatpush3.bf16.msra.mxu1 %v1310_v11  ;;  %v1624_v17 = vld [vmem:[%s2069_s28] sm:$0xff]  ;;  %v1316_v18 = vpack.c.bf16 %v163_v15, %v162_v14  ;;  %v165_v20 = vld [vmem:[%s2068_s26 + $0x38] sm:$0xff]  ;;  %v167_v23 = vld [vmem:[%s2068_s26 + $0x48] sm:$0xff] }
   0xd   :  { %1312 = vmatprep.subr.bf16.mxu1 %v1473_v0  ;;  %v1319_v21 = vpack.c.bf16 %v165_v20, %v164_v19  ;;  %v166_v22 = vld [vmem:[%s2068_s26 + $0x40] sm:$0xff]  ;;  %v168_v25 = vld [vmem:[%s2068_s26 + $0x50] sm:$0xff]  ;;  %v169_v26 = vld [vmem:[%s2068_s26 + $0x58] sm:$0xff] }
   0xe   :  { %v1322_v24 = vpack.c.bf16 %v167_v23, %v166_v22  ;;  %v1325_v27 = vpack.c.bf16 %v169_v26, %v168_v25  ;;  %v170_v28 = vld [vmem:[%s2068_s26 + $0x60] sm:$0xff]  ;;  %v171_v29 = vld [vmem:[%s2068_s26 + $0x68] sm:$0xff]  ;;  %v172_v31 = vld [vmem:[%s2068_s26 + $0x70] sm:$0xff] }
   0xf   :  { %1308 = vmatpush3.bf16.msra.mxu0 %v1307_v10  ;;  %v1328_v30 = vpack.c.bf16 %v171_v29, %v170_v28  ;;  %v173_v32 = vld [vmem:[%s2068_s26 + $0x78] sm:$0xff]  ;;  %v254_v34 = vld [vmem:[%s2070_s23] sm:$0xff]  ;;  %v255_v35 = vld [vmem:[%s2070_s23 + $0x8] sm:$0xff] }
  0x10   :  { %1064 = vmatprep.subr.mxu0 %v1475_v4  ;;  %1314 = vmatpush3.bf16.msra.mxu1 %v1313_v13  ;;  %v1331_v33 = vpack.c.bf16 %v173_v32, %v172_v31  ;;  %v256_v36 = vld [vmem:[%s2070_s23 + $0x10] sm:$0xff]  ;;  %v1334_v37 = vpack.c.bf16 %v255_v35, %v254_v34  ;;  %v257_v38 = vld [vmem:[%s2070_s23 + $0x18] sm:$0xff]  ;;  %v258_v40 = vld [vmem:[%s2070_s23 + $0x20] sm:$0xff] }
  0x11   :  { %1315 = vmatprep.subr.bf16.mxu1 %v1473_v0  ;;  %v1337_v39 = vpack.c.bf16 %v257_v38, %v256_v36  ;;  %v259_v41 = vld [vmem:[%s2070_s23 + $0x28] sm:$0xff]  ;;  %v260_v43 = vld [vmem:[%s2070_s23 + $0x30] sm:$0xff]  ;;  %v261_v44 = vld [vmem:[%s2070_s23 + $0x38] sm:$0xff] }
  0x12   :  { %v1340_v42 = vpack.c.bf16 %v259_v41, %v258_v40  ;;  %v1343_v45 = vpack.c.bf16 %v261_v44, %v260_v43  ;;  %v262_v46 = vld [vmem:[%s2070_s23 + $0x40] sm:$0xff]  ;;  %v263_v47 = vld [vmem:[%s2070_s23 + $0x48] sm:$0xff]  ;;  %v264_v49 = vld [vmem:[%s2070_s23 + $0x50] sm:$0xff] }
  0x13   :  { %1065 = vmatpush3.msk.msra.mxu0 %vm81_vm1, %v69_v16  ;;  %v1346_v48 = vpack.c.bf16 %v263_v47, %v262_v46  ;;  %v265_v50 = vld [vmem:[%s2070_s23 + $0x58] sm:$0xff]  ;;  %v266_v52 = vld [vmem:[%s2070_s23 + $0x60] sm:$0xff]  ;;  %v267_v53 = vld [vmem:[%s2070_s23 + $0x68] sm:$0xff] }
  0x14   :  { %1067 = vmatmul.mubr.msk.f32.vlgmr.msra.gmra.mrb[0].mxu0 %vm77_vm2, %v1624_v17  ;;  %1333 = vmatprep.subr.bf16.mxu0 %v1473_v0  ;;  %v1349_v51 = vpack.c.bf16 %v265_v50, %v264_v49  ;;  %v1352_v54 = vpack.c.bf16 %v267_v53, %v266_v52  ;;  %v268_v61 = vld [vmem:[%s2070_s23 + $0x70] sm:$0xff]  ;;  %v269_v62 = vld [vmem:[%s2070_s23 + $0x78] sm:$0xff]  ;;  %v64_v1 = vld [vmem:[%s2045_s1] sm:$0xff] }
  0x15   :  { %1317 = vmatpush3.bf16.msra.mxu1 %v1316_v18  ;;  %1136 = vmatprep.mubr.msk.f32.mxu0 %vm1474_vm0, %v1475_v4  ;;  %v1355_v63 = vpack.c.bf16 %v269_v62, %v268_v61  ;;  %v928_v2 = vld [vmem:[%s2046_s5] ss:$0 sm:$0xff]  ;;  %v371_v10 = vld [vmem:[%s2048_s8 + $0x8] sm:$0xff]  ;;  %v372_v11 = vld [vmem:[%s2048_s8 + $0x10] sm:$0xff] }
  0x16   :  { %1318 = vmatprep.subr.bf16.mxu1 %v1473_v0  ;;  %1335 = vmatpush3.bf16.msra.mxu0 %v1334_v37  ;;  %v370_v9 = vld [vmem:[%s2048_s8] sm:$0xff]  ;;  %v373_v14 = vld [vmem:[%s2048_s8 + $0x18] sm:$0xff]  ;;  %v461_v26 = vld [vmem:[%s2049_s10 + $0x8] sm:$0xff] }
  0x17   :  { %1336 = vmatprep.subr.bf16.mxu0 %v1473_v0  ;;  %361 = vrot.lane.b32.xlu0 %v64_v1, %s1476_s29  ;;  %v929_v12 = vld [vmem:[%s2047_s7] ss:$0 sm:$0xff]  ;;  %v1358_v13 = vpack.c.bf16 %v371_v10, %v370_v9  ;;  %v1361_v16 = vpack.c.bf16 %v373_v14, %v372_v11  ;;  %v465_v34 = vld [vmem:[%s2049_s10 + $0x28] sm:$0xff]  ;;  %v466_v37 = vld [vmem:[%s2049_s10 + $0x30] sm:$0xff] }
  0x18   :  { %v460_v25 = vld [vmem:[%s2049_s10] sm:$0xff]  ;;  %v467_v38 = vld [vmem:[%s2049_s10 + $0x38] sm:$0xff]  ;;  %v469_v41 = vld [vmem:[%s2049_s10 + $0x48] sm:$0xff] }
  0x19   :  { %1320 = vmatpush3.bf16.msra.mxu1 %v1319_v21  ;;  %v1370_v29 = vpack.c.bf16 %v461_v26, %v460_v25  ;;  %v468_v40 = vld [vmem:[%s2049_s10 + $0x40] sm:$0xff]  ;;  %v470_v43 = vld [vmem:[%s2049_s10 + $0x50] sm:$0xff]  ;;  %v471_v44 = vld [vmem:[%s2049_s10 + $0x58] sm:$0xff] }
  0x1a   :  { %1321 = vmatprep.subr.bf16.mxu1 %v1473_v0  ;;  %1338 = vmatpush3.bf16.msra.mxu0 %v1337_v39  ;;  %v1379_v39 = vpack.c.bf16 %v467_v38, %v466_v37  ;;  %v472_v46 = vld [vmem:[%s2049_s10 + $0x60] sm:$0xff]  ;;  %v473_v47 = vld [vmem:[%s2049_s10 + $0x68] sm:$0xff]  ;;  %v474_v62 = vld [vmem:[%s2049_s10 + $0x70] sm:$0xff] }
  0x1b   :  { %1339 = vmatprep.subr.bf16.mxu0 %v1473_v0  ;;  %v476_v49 = vld [vmem:[%s2050_s11] sm:$0xff]  ;;  %v477_v50 = vld [vmem:[%s2050_s11 + $0x8] sm:$0xff]  ;;  %v731_v38 = vld [vmem:[%s2054_s15 + $0x10] sm:$0xff] }
  0x1c   :  { %v637_v9 = vld [vmem:[%s2052_s13 + $0x20] sm:$0xff]  ;;  %v638_v10 = vld [vmem:[%s2052_s13 + $0x28] sm:$0xff] }
  0x1d   :  { %1323 = vmatpush3.bf16.msra.mxu1 %v1322_v24  ;;  %v1400_v11 = vpack.c.bf16 %v638_v10, %v637_v9  ;;  %v730_v37 = vld [vmem:[%s2054_s15 + $0x8] sm:$0xff] }
  0x1e   :  { %1324 = vmatprep.subr.bf16.mxu1 %v1473_v0  ;;  %1341 = vmatpush3.bf16.msra.mxu0 %v1340_v42  ;;  %v1382_v42 = vpack.c.bf16 %v469_v41, %v468_v40  ;;  %v732_v40 = vld [vmem:[%s2054_s15 + $0x18] sm:$0xff]  ;;  %v828_v9 = vld [vmem:[%s2056_s17 + $0x28] sm:$0xff] }
  0x1f   :  { %1342 = vmatprep.subr.bf16.mxu0 %v1473_v0  ;;  %v1421_v41 = vpack.c.bf16 %v732_v40, %v731_v38 }
  0x21   :  { %1326 = vmatpush3.bf16.msra.mxu1 %v1325_v27  ;;  %v462_v27 = vld [vmem:[%s2049_s10 + $0x10] sm:$0xff] }
  0x22   :  { %1327 = vmatprep.subr.bf16.mxu1 %v1473_v0  ;;  %1344 = vmatpush3.bf16.msra.mxu0 %v1343_v45  ;;  %v1385_v45 = vpack.c.bf16 %v471_v44, %v470_v43  ;;  %v734_v43 = vld [vmem:[%s2054_s15 + $0x28] sm:$0xff] }
  0x23   :  { %1345 = vmatprep.subr.bf16.mxu0 %v1473_v0 }
  0x25   :  { %1329 = vmatpush3.bf16.msra.mxu1 %v1328_v30  ;;  %v463_v30 = vld [vmem:[%s2049_s10 + $0x18] sm:$0xff] }
  0x26   :  { %1330 = vmatprep.subr.bf16.mxu1 %v1473_v0  ;;  %1347 = vmatpush3.bf16.msra.mxu0 %v1346_v48  ;;  %v1373_v32 = vpack.c.bf16 %v463_v30, %v462_v27  ;;  %v1388_v48 = vpack.c.bf16 %v473_v47, %v472_v46  ;;  %v736_v46 = vld [vmem:[%s2054_s15 + $0x38] sm:$0xff] }
  0x27   :  { %1348 = vmatprep.subr.bf16.mxu0 %v1473_v0 }
  0x29   :  { %1332 = vmatpush3.bf16.msra.mxu1 %v1331_v33  ;;  %v464_v33 = vld [vmem:[%s2049_s10 + $0x20] sm:$0xff] }
  0x2a   :  { %1357 = vmatprep.subr.bf16.mxu1 %v1473_v0  ;;  %1350 = vmatpush3.bf16.msra.mxu0 %v1349_v51  ;;  %v1376_v36 = vpack.c.bf16 %v465_v34, %v464_v33  ;;  %v1364_v51 = vpack.c.bf16 %v477_v50, %v476_v49  ;;  %v647_v33 = vld [vmem:[%s2052_s13 + $0x70] sm:$0xff]  ;;  %v648_v34 = vld [vmem:[%s2052_s13 + $0x78] sm:$0xff]  ;;  %v738_v49 = vld [vmem:[%s2054_s15 + $0x48] sm:$0xff] }
  0x2b   :  { %1351 = vmatprep.subr.bf16.mxu0 %v1473_v0 }
  0x2e   :  { %1353 = vmatpush3.bf16.msra.mxu0 %v1352_v54 }
  0x2f   :  { %1354 = vmatprep.subr.bf16.mxu0 %v1473_v0 }
  0x32   :  { %1356 = vmatpush3.bf16.msra.mxu0 %v1355_v63  ;;  %v475_v63 = vld [vmem:[%s2049_s10 + $0x78] sm:$0xff] }
  0x33   :  { %1369 = vmatprep.subr.bf16.mxu0 %v1473_v0  ;;  %v1391_v1 = vpack.c.bf16 %v475_v63, %v474_v62  ;;  %v743_v63 = vld [vmem:[%s2054_s15 + $0x70] sm:$0xff] }
  0x89   :  { %v362_v23 = vpop.permute.xlu0 %361 }
  0xe7   :  { %v151_v56 = vpop.f32.mrb[0].mxu0 }
  0xe8   :  { %v152_v57 = vadd.f32 %v925_v55, %v151_v56  ;;  %v1068_v58 = vpop.f32.mrb[1].mxu0 }
  0xea   :  { %v156_v59 = vmul.f32 0.01, %v152_v57  ;;  %vm155_vm3 = vcmp.gt.f32.partialorder %v152_v57, 0.0 }
  0xec   :  { %v157_v60 = vsel %vm155_vm3, %v152_v57, %v156_v59  ;;  %v478_v59 = vld [vmem:[%s2050_s11 + $0x10] sm:$0xff] }
  0xed   :  { %1102 = vmatmul.mubr.f32.vlgmr.msra.gmra.mrb[0].mxu1 %v157_v60  ;;  %v479_v60 = vld [vmem:[%s2050_s11 + $0x18] sm:$0xff] }
  0xee   :  { %1147 = vmatprep.mubr.msk.f32.mxu1 %vm1474_vm0, %v1475_v4  ;;  %1359 = vmatpush3.bf16.msra.mxu1 %v1358_v13  ;;  %v1367_v61 = vpack.c.bf16 %v479_v60, %v478_v59  ;;  %v640_v13 = vld [vmem:[%s2052_s13 + $0x38] sm:$0xff] }
  0xef   :  { %1360 = vmatprep.subr.bf16.mxu1 %v1473_v0 }
  0xf2   :  { %1362 = vmatpush3.bf16.msra.mxu1 %v1361_v16  ;;  %v642_v16 = vld [vmem:[%s2052_s13 + $0x48] sm:$0xff] }
  0xf3   :  { %1363 = vmatprep.subr.bf16.mxu1 %v1473_v0 }
 0x1c0   :  { %v247_v3 = vpop.f32.mrb[0].mxu1 }
 0x1c1   :  { %v248_v5 = vadd.f32 %v928_v2, %v247_v3  ;;  %v1103_v6 = vpop.f32.mrb[1].mxu1  ;;  %v480_v2 = vld [vmem:[%s2050_s11 + $0x20] sm:$0xf] }
 0x1c2   :  { %v633_v3 = vld [vmem:[%s2052_s13] sm:$0xff]  ;;  %v635_v6 = vld [vmem:[%s2052_s13 + $0x10] sm:$0xff] }
 0x1c3   :  { %vm251_vm4 = vcmp.gt.f32.partialorder %v248_v5, 0.0  ;;  %v252_v7 = vmul.f32 0.01, %v248_v5 }
 0x1c5   :  { %v253_v8 = vsel %vm251_vm4, %v248_v5, %v252_v7  ;;  %v634_v5 = vld [vmem:[%s2052_s13 + $0x8] sm:$0xff] }
 0x1c6   :  { %1137 = vmatmul.mubr.f32.vlgmr.msra.gmra.mrb[2].mxu0 %v253_v8  ;;  %v1394_v7 = vpack.c.bf16 %v634_v5, %v633_v3  ;;  %v823_v3 = vld [vmem:[%s2056_s17] sm:$0xff]  ;;  %v824_v5 = vld [vmem:[%s2056_s17 + $0x8] sm:$0xff] }
 0x1c7   :  { %1195 = vmatprep.mubr.msk.f32.mxu0 %vm1474_vm0, %v1475_v4  ;;  %1371 = vmatpush3.bf16.msra.mxu0 %v1370_v29  ;;  %v646_v29 = vld [vmem:[%s2052_s13 + $0x68] sm:$0xff] }
 0x1c8   :  { %1372 = vmatprep.subr.bf16.mxu0 %v1473_v0 }
 0x1cb   :  { %1374 = vmatpush3.bf16.msra.mxu0 %v1373_v32 }
 0x1cc   :  { %1375 = vmatprep.subr.bf16.mxu0 %v1473_v0 }
 0x1cf   :  { %1377 = vmatpush3.bf16.msra.mxu0 %v1376_v36  ;;  %v729_v36 = vld [vmem:[%s2054_s15] sm:$0xff] }
 0x1d0   :  { %1378 = vmatprep.subr.bf16.mxu0 %v1473_v0 }
 0x1d3   :  { %1380 = vmatpush3.bf16.msra.mxu0 %v1379_v39  ;;  %v1418_v39 = vpack.c.bf16 %v730_v37, %v729_v36  ;;  %v840_v37 = vstv %s2059_s18 }
 0x1d4   :  { %1381 = vmatprep.subr.bf16.mxu0 %v1473_v0 }
 0x1d7   :  { %1383 = vmatpush3.bf16.msra.mxu0 %v1382_v42  ;;  %v733_v42 = vld [vmem:[%s2054_s15 + $0x20] sm:$0xff] }
 0x1d8   :  { %1384 = vmatprep.subr.bf16.mxu0 %v1473_v0  ;;  %v1424_v44 = vpack.c.bf16 %v734_v43, %v733_v42 }
 0x1db   :  { %1386 = vmatpush3.bf16.msra.mxu0 %v1385_v45  ;;  %v735_v45 = vld [vmem:[%s2054_s15 + $0x30] sm:$0xff] }
 0x1dc   :  { %1387 = vmatprep.subr.bf16.mxu0 %v1473_v0  ;;  %v1427_v47 = vpack.c.bf16 %v736_v46, %v735_v45 }
 0x1df   :  { %1389 = vmatpush3.bf16.msra.mxu0 %v1388_v48  ;;  %v737_v48 = vld [vmem:[%s2054_s15 + $0x40] sm:$0xff] }
 0x1e0   :  { %1390 = vmatprep.subr.bf16.mxu0 %v1473_v0  ;;  %v1430_v50 = vpack.c.bf16 %v738_v49, %v737_v48 }
 0x1e3   :  { %1392 = vmatpush3.bf16.msra.mxu0 %v1391_v1  ;;  %v744_v1 = vld [vmem:[%s2054_s15 + $0x78] sm:$0xff] }
 0x1e4   :  { %1417 = vmatprep.subr.bf16.mxu0 %v1473_v0 }
 0x299   :  { %v343_v15 = vpop.f32.mrb[2].mxu0 }
 0x29a   :  { %v1754_v18 = vadd.f32 %v929_v12, %v343_v15  ;;  %v1138_v19 = vpop.f32.mrb[3].mxu0  ;;  %v639_v12 = vld [vmem:[%s2052_s13 + $0x30] sm:$0xff]  ;;  %v641_v15 = vld [vmem:[%s2052_s13 + $0x40] sm:$0xff] }
 0x29b   :  { %v1403_v14 = vpack.c.bf16 %v640_v13, %v639_v12  ;;  %v643_v19 = vld [vmem:[%s2052_s13 + $0x50] sm:$0xff]  ;;  %v830_v12 = vld [vmem:[%s2056_s17 + $0x38] sm:$0xff] }
 0x29c   :  { %366 = vrot.lane.b32.xlu0 %v1754_v18, %s1476_s29  ;;  %v347_v20 = vmul.f32 0.5, %v1754_v18  ;;  %v351_v35 = vmul.f32 %v1754_v18, %v1754_v18  ;;  %v350_v53 = vadd.f32 1.0, %v1754_v18  ;;  %v1406_v18 = vpack.c.bf16 %v642_v16, %v641_v15  ;;  %v832_v15 = vld [vmem:[%s2056_s17 + $0x48] sm:$0xff] }
 0x29e   :  { %v348_v21 = vmul.f32 1.442695, %v347_v20  ;;  %v644_v20 = vld [vmem:[%s2052_s13 + $0x58] sm:$0xff] }
 0x2a0   :  { %1471 = vpow2.f32 %v348_v21  ;;  %v1409_v21 = vpack.c.bf16 %v644_v20, %v643_v19  ;;  %v834_v19 = vld [vmem:[%s2056_s17 + $0x58] sm:$0xff] }
 0x2aa   :  { %v1472_v22 = vpop.eup %1471 }
 0x2ab   :  { %v364_v24 = vmul.f32 %v1472_v22, %v362_v23  ;;  %v357_v56 = vmul.f32 %v1472_v22, %v1472_v22  ;;  %v930_v22 = vld [vmem:[%s2053_s9] ss:$0 sm:$0xff] }
 0x30e   :  { %v367_v28 = vpop.permute.xlu0 %366 }
 0x30f   :  { %v369_v31 = vadd.f32 %v367_v28, %v364_v24  ;;  %v645_v28 = vld [vmem:[%s2052_s13 + $0x60] sm:$0xff] }
 0x310   :  { %v1412_v30 = vpack.c.bf16 %v646_v29, %v645_v28 }
 0x311   :  { %382 = vrot.lane.b32.xlu1 %v369_v31, %s1477_s2 }
 0x315   :  { %353 = vrot.lane.b32.xlu1 %v351_v35, %s1476_s29  ;;  %v1415_v35 = vpack.c.bf16 %v648_v34, %v647_v33 }
 0x383   :  { %v383_v52 = vpop.permute.xlu1 %382 }
 0x384   :  { %912 = vst.msk [vmem:[%s2051_s19] sm:$0xff] %vm384_vm5, %v383_v52  ;;  %1148 = vmatmul.mubr.msk.f32.vlgmr.msra.gmra.mrb[2].mxu1 %vm384_vm5, %v383_v52  ;;  %v740_v52 = vld [vmem:[%s2054_s15 + $0x58] sm:$0xff] }
 0x385   :  { %1365 = vmatpush3.bf16.msra.mxu1 %v1364_v51  ;;  %1160 = vmatprep.mubr.msk.f32.mxu1 %vm1474_vm0, %v1475_v4  ;;  %v739_v51 = vld [vmem:[%s2054_s15 + $0x50] sm:$0xff] }
 0x386   :  { %1366 = vmatprep.subr.bf16.mxu1 %v1473_v0 }
 0x387   :  { %v354_v54 = vpop.permute.xlu1 %353 }
 0x388   :  { %v356_v55 = vsub.f32 %v350_v53, %v354_v54  ;;  %v1433_v53 = vpack.c.bf16 %v740_v52, %v739_v51  ;;  %v741_v54 = vld [vmem:[%s2054_s15 + $0x60] sm:$0xff] }
 0x389   :  { %1368 = vmatpush3.bf16.msra.mxu1 %v1367_v61 }
 0x38a   :  { %v358_v57 = vsub.f32 %v356_v55, %v357_v56  ;;  %1158 = vmatprep.subr.mxu1 %v1475_v4  ;;  %v742_v55 = vld [vmem:[%s2054_s15 + $0x68] sm:$0xff] }
 0x38b   :  { %v1436_v56 = vpack.c.bf16 %v742_v55, %v741_v54 }
 0x38c   :  { %v359_v58 = vmul.f32 -0.5, %v358_v57 }
 0x38d   :  { %1159 = vmatpush3.msk.msra.mxu1 %vm81_vm1, %v480_v2  ;;  %v1439_v2 = vpack.c.bf16 %v744_v1, %v743_v63 }
 0x38e   :  { %914 = vst.msk [vmem:[%s2051_s19] sm:$0xff] %vm913_vm6, %v359_v58  ;;  %1161 = vmatmul.mubr.msk.f32.vlgmr.msra.gmra.mrb[4].mxu1 %vm77_vm2, %v1624_v17  ;;  %1393 = vmatprep.subr.bf16.mxu1 %v1473_v0  ;;  %v636_v17 = vld [vmem:[%s2052_s13 + $0x18] sm:$0xff]  ;;  %v934_v58 = vld [vmem:[%s2055_s12] ss:$0 sm:$0xff] }
 0x38f   :  { %1230 = vmatprep.mubr.msk.f32.mxu1 %vm1474_vm0, %v1475_v4  ;;  %1395 = vmatpush3.bf16.msra.mxu1 %v1394_v7  ;;  %v1397_v8 = vpack.c.bf16 %v636_v17, %v635_v6  ;;  %v1442_v6 = vpack.c.bf16 %v824_v5, %v823_v3  ;;  %v826_v7 = vld [vmem:[%s2056_s17 + $0x18] sm:$0xff] }
 0x390   :  { %1396 = vmatprep.subr.bf16.mxu1 %v1473_v0 }
 0x393   :  { %1398 = vmatpush3.bf16.msra.mxu1 %v1397_v8  ;;  %v827_v8 = vld [vmem:[%s2056_s17 + $0x20] sm:$0xff] }
 0x394   :  { %1399 = vmatprep.subr.bf16.mxu1 %v1473_v0  ;;  %v1448_v10 = vpack.c.bf16 %v828_v9, %v827_v8 }
 0x397   :  { %1401 = vmatpush3.bf16.msra.mxu1 %v1400_v11  ;;  %v829_v11 = vld [vmem:[%s2056_s17 + $0x30] sm:$0xff] }
 0x398   :  { %1402 = vmatprep.subr.bf16.mxu1 %v1473_v0  ;;  %v1451_v13 = vpack.c.bf16 %v830_v12, %v829_v11 }
 0x39b   :  { %1404 = vmatpush3.bf16.msra.mxu1 %v1403_v14  ;;  %v831_v14 = vld [vmem:[%s2056_s17 + $0x40] sm:$0xff] }
 0x39c   :  { %1405 = vmatprep.subr.bf16.mxu1 %v1473_v0  ;;  %v1454_v16 = vpack.c.bf16 %v832_v15, %v831_v14 }
 0x39f   :  { %1407 = vmatpush3.bf16.msra.mxu1 %v1406_v18  ;;  %v833_v18 = vld [vmem:[%s2056_s17 + $0x50] sm:$0xff] }
 0x3a0   :  { %1408 = vmatprep.subr.bf16.mxu1 %v1473_v0  ;;  %v1457_v20 = vpack.c.bf16 %v834_v19, %v833_v18 }
 0x3a3   :  { %1410 = vmatpush3.bf16.msra.mxu1 %v1409_v21  ;;  %v835_v21 = vld [vmem:[%s2056_s17 + $0x60] sm:$0xff] }
 0x3a4   :  { %1411 = vmatprep.subr.bf16.mxu1 %v1473_v0 }
 0x3a7   :  { %1413 = vmatpush3.bf16.msra.mxu1 %v1412_v30  ;;  %v837_v30 = vld [vmem:[%s2056_s17 + $0x70] sm:$0xff] }
 0x3a8   :  { %1414 = vmatprep.subr.bf16.mxu1 %v1473_v0 }
 0x3ab   :  { %1416 = vmatpush3.bf16.msra.mxu1 %v1415_v35 }
 0x3ac   :  { %1441 = vmatprep.subr.bf16.mxu1 %v1473_v0 }
 0x457   :  { %v453_v23 = vpop.f32.mrb[2].mxu1 }
 0x458   :  { %v454_v24 = vadd.f32 %v930_v22, %v453_v23  ;;  %v1149_v25 = vpop.f32.mrb[3].mxu1  ;;  %v836_v22 = vld [vmem:[%s2056_s17 + $0x68] sm:$0xff] }
 0x459   :  { %v1460_v23 = vpack.c.bf16 %v836_v22, %v835_v21 }
 0x45a   :  { %vm457_vm7 = vcmp.gt.f32.partialorder %v454_v24, 0.0  ;;  %v458_v26 = vmul.f32 0.01, %v454_v24 }
 0x45c   :  { %v459_v27 = vsel %vm457_vm7, %v454_v24, %v458_v26  ;;  %v935_v24 = vld [vmem:[%s2057_s14] ss:$0 sm:$0xff] }
 0x45d   :  { %1196 = vmatmul.mubr.f32.vlgmr.msra.gmra.mrb[4].mxu0 %v459_v27 }
 0x45e   :  { %1265 = vmatprep.mubr.msk.f32.mxu0 %vm1474_vm0, %v1475_v4  ;;  %1419 = vmatpush3.bf16.msra.mxu0 %v1418_v39 }
 0x45f   :  { %1420 = vmatprep.subr.bf16.mxu0 %v1473_v0 }
 0x461   :  { %v550_v31 = vpop.f32.mrb[4].mxu1 }
 0x462   :  { %v1162_v32 = vpop.f32.mrb[5].mxu1  ;;  %1422 = vmatpush3.bf16.msra.mxu0 %v1421_v41 }
 0x463   :  { %1423 = vmatprep.subr.bf16.mxu0 %v1473_v0  ;;  %v936_v32 = vld [vmem:[%s2058_s16] ss:$0 sm:$0xff] }
 0x466   :  { %1425 = vmatpush3.bf16.msra.mxu0 %v1424_v44 }
 0x467   :  { %1426 = vmatprep.subr.bf16.mxu0 %v1473_v0 }
 0x46a   :  { %1428 = vmatpush3.bf16.msra.mxu0 %v1427_v47 }
 0x46b   :  { %1429 = vmatprep.subr.bf16.mxu0 %v1473_v0 }
 0x46e   :  { %1431 = vmatpush3.bf16.msra.mxu0 %v1430_v50 }
 0x46f   :  { %1432 = vmatprep.subr.bf16.mxu0 %v1473_v0 }
 0x472   :  { %1434 = vmatpush3.bf16.msra.mxu0 %v1433_v53 }
 0x473   :  { %1435 = vmatprep.subr.bf16.mxu0 %v1473_v0 }
 0x476   :  { %1437 = vmatpush3.bf16.msra.mxu0 %v1436_v56 }
 0x477   :  { %1438 = vmatprep.subr.bf16.mxu0 %v1473_v0 }
 0x47a   :  { %1440 = vmatpush3.bf16.msra.mxu0 %v1439_v2 }
 0x530   :  { %v620_v57 = vpop.f32.mrb[4].mxu0 }
 0x531   :  { %v621_v59 = vadd.f32 %v620_v57, %v550_v31  ;;  %v1197_v60 = vpop.f32.mrb[5].mxu0  ;;  %v838_v31 = vld [vmem:[%s2056_s17 + $0x78] sm:$0xff] }
 0x533   :  { %v631_v61 = vadd.f32 %v934_v58, %v621_v59 }
 0x535   :  { %v632_v62 = vmax.f32 %v631_v61, 0.0 }
 0x537   :  { %1231 = vmatmul.mubr.f32.vlgmr.msra.gmra.mrb[6].mxu1 %v632_v62 }
 0x538   :  { %1300 = vmatprep.mubr.msk.f32.mxu1 %vm1474_vm0, %v1475_v4  ;;  %v825_v4 = vld [vmem:[%s2056_s17 + $0x10] sm:$0xff]  ;;  %1443 = vmatpush3.bf16.msra.mxu1 %v1442_v6 }
 0x539   :  { %v1445_v17 = vpack.c.bf16 %v826_v7, %v825_v4  ;;  %1444 = vmatprep.subr.bf16.mxu1 %v1473_v0 }
 0x53c   :  { %1446 = vmatpush3.bf16.msra.mxu1 %v1445_v17 }
 0x53d   :  { %1447 = vmatprep.subr.bf16.mxu1 %v1473_v0 }
 0x540   :  { %1449 = vmatpush3.bf16.msra.mxu1 %v1448_v10 }
 0x541   :  { %1450 = vmatprep.subr.bf16.mxu1 %v1473_v0 }
 0x544   :  { %1452 = vmatpush3.bf16.msra.mxu1 %v1451_v13 }
 0x545   :  { %1453 = vmatprep.subr.bf16.mxu1 %v1473_v0 }
 0x548   :  { %1455 = vmatpush3.bf16.msra.mxu1 %v1454_v16 }
 0x549   :  { %1456 = vmatprep.subr.bf16.mxu1 %v1473_v0 }
 0x54c   :  { %1458 = vmatpush3.bf16.msra.mxu1 %v1457_v20 }
 0x54d   :  { %1459 = vmatprep.subr.bf16.mxu1 %v1473_v0 }
 0x550   :  { %1461 = vmatpush3.bf16.msra.mxu1 %v1460_v23 }
 0x551   :  { %1462 = vmatprep.subr.bf16.mxu1 %v1473_v0  ;;  %v1463_v0 = vpack.c.bf16 %v838_v31, %v837_v30 }
 0x554   :  { %1464 = vmatpush3.bf16.msra.mxu1 %v1463_v0 }
 0x60a   :  { %v722_v25 = vpop.f32.mrb[6].mxu1 }
 0x60b   :  { %v723_v26 = vadd.f32 %v935_v24, %v722_v25  ;;  %v1232_v27 = vpop.f32.mrb[7].mxu1 }
 0x60d   :  { %vm726_vm8 = vcmp.gt.f32.partialorder %v723_v26, 0.0  ;;  %v727_v28 = vmul.f32 0.01, %v723_v26 }
 0x60f   :  { %v728_v29 = vsel %vm726_vm8, %v723_v26, %v727_v28 }
 0x610   :  { %1266 = vmatmul.mubr.f32.vlgmr.msra.gmra.mrb[6].mxu0 %v728_v29 }
 0x6e3   :  { %v818_v33 = vpop.f32.mrb[6].mxu0 }
 0x6e4   :  { %v819_v34 = vadd.f32 %v936_v32, %v818_v33  ;;  %v1267_v35 = vpop.f32.mrb[7].mxu0 }
 0x6e6   :  { %v822_v36 = vmax.f32 %v819_v34, 0.0 }
 0x6e8   :  { %1301 = vmatmul.mubr.f32.vlgmr.msra.gmra.mrb[8].mxu1 %v822_v36 }
 0x7bb   :  { %v907_v38 = vpop.f32.mrb[8].mxu1 }
 0x7bc   :  { %v908_v39 = vadd.f32 %v907_v38, %v840_v37  ;;  %v1302_v40 = vpop.f32.mrb[9].mxu1 }
 0x7be   :  { %916 = vrot.lane.b32.xlu0 %v908_v39, %s1478_s21 }
 0x830   :  { %v917_v41 = vpop.permute.xlu0 %916 }
 0x831   :  { %920 = vst.msk [vmem:[%s2051_s19] sm:$0xff] %vm919_vm9, %v917_v41 }

</bundles_post_ra>
